<compile_context>
chip_gen: v7x
topology: tpu7x:2x2x1
jax: 0.10.0
libtpu: 0.0.40
codegen_flags: <defaults>
</compile_context>

<pallas_src>
import jax
import jax.numpy as jnp
from jax.experimental import pallas as pl
from jax.experimental.pallas import tpu as pltpu


def attention_kernel(hs_ref, len_ref, wqT_ref, bq_ref, wkT_ref, bk_ref, out_ref):
    hs = hs_ref[...]                                   # (T, BB, H) f32
    T, BB, H = hs.shape

    # Query: mean over time first, then the affine projection (numerically the
    # same as projecting every timestep and averaging, 1/T of the MXU work).
    mean_hs = jnp.mean(hs, axis=0)                                      # (BB, H)
    query = (
        jnp.dot(mean_hs, wqT_ref[...], preferred_element_type=jnp.float32)
        + bq_ref[...]
    )                                                                   # (BB, H)

    # Key: one (T*BB, H) @ (H, H) matmul for the whole batch block, then tanh.
    k_proj = jnp.tanh(
        jnp.dot(hs.reshape(T * BB, H), wkT_ref[...],
                preferred_element_type=jnp.float32)
        + bk_ref[...]
    ).reshape(T, BB, H)

    # Attention scores: <key_tb, query_b> over H  -> (T, BB, 1)
    scores = jnp.sum(k_proj * query[None, :, :], axis=-1, keepdims=True)

    # Length mask: positions >= length get -10000 added (matches torch.ge * -1e4).
    lengths = len_ref[...]                                              # (BB, 1) i32
    idx = jax.lax.broadcasted_iota(jnp.int32, (T, BB, 1), 0)
    scores = scores + jnp.where(idx >= lengths[None, :, :],
                                jnp.float32(-10000.0), jnp.float32(0.0))

    # Softmax over time (axis 0).
    m = jnp.max(scores, axis=0, keepdims=True)
    e = jnp.exp(scores - m)
    probs = e / jnp.sum(e, axis=0, keepdims=True)                       # (T, BB, 1)

    # Weighted sum of hidden states over time -> (BB, H).
    out_ref[...] = jnp.sum(probs * hs, axis=0).astype(out_ref.dtype)


def _choose_batch_block(B):
    # The batch dim is the second-minor dim of the (T, B, H) input, so the block
    # extent must be a multiple of 8 or the full extent.  Prefer >= 2 grid steps
    # so dimension_semantics=("parallel",) can split work across TensorCores.
    if B % 8 == 0 and B >= 16:
        for cand in (32, 16, 8):
            if B % cand == 0 and B // cand >= 2:
                return cand
    return B


def attention_pallas(hidden_states, lengths, wq, bq, wk, bk):
    """hidden_states: (T, B, H) f32; lengths: (B,) int; wq/wk: (H, H) nn.Linear
    weights (out, in); bq/bk: (H,).  Returns (B, H)."""
    T, B, H = hidden_states.shape
    bb = _choose_batch_block(B)
    n_blocks = B // bb

    hs = hidden_states.astype(jnp.float32)             # native (T, B, H) layout, no transpose
    wq_t = wq.T.astype(jnp.float32)                    # (H_in, H_out) for x @ W^T
    wk_t = wk.T.astype(jnp.float32)
    bq2 = bq.reshape(1, H).astype(jnp.float32)
    bk2 = bk.reshape(1, H).astype(jnp.float32)
    len2 = lengths.astype(jnp.int32).reshape(B, 1)

    return pl.pallas_call(
        attention_kernel,
        out_shape=jax.ShapeDtypeStruct((B, H), jnp.float32),
        grid_spec=pltpu.PrefetchScalarGridSpec(
            num_scalar_prefetch=0,
            grid=(n_blocks,),
            in_specs=[
                pl.BlockSpec((T, bb, H), lambda i: (0, i, 0)),   # hidden-state block
                pl.BlockSpec((bb, 1), lambda i: (i, 0)),         # lengths block
                pl.BlockSpec((H, H), lambda i: (0, 0)),          # Wq^T (resident)
                pl.BlockSpec((1, H), lambda i: (0, 0)),          # bq
                pl.BlockSpec((H, H), lambda i: (0, 0)),          # Wk^T (resident)
                pl.BlockSpec((1, H), lambda i: (0, 0)),          # bk
            ],
            out_specs=pl.BlockSpec((bb, H), lambda i: (i, 0)),
        ),
        compiler_params=pltpu.CompilerParams(
            dimension_semantics=("parallel",),
        ),
    )(hs, len2, wq_t, bq2, wk_t, bk2)


def attention_ref(hidden_states, lengths, wq, bq, wk, bk):
    """Pure-JAX reference mirroring the PyTorch forward exactly."""
    q = hidden_states @ wq.T + bq                        # (T, B, H)
    query = jnp.mean(q, axis=0, keepdims=True)           # (1, B, H)
    key = jnp.tanh(hidden_states @ wk.T + bk)            # (T, B, H)
    query_p = jnp.transpose(query, (1, 2, 0))            # (B, H, 1)
    key_p = jnp.transpose(key, (1, 0, 2))                # (B, T, H)
    scores = jnp.matmul(key_p, query_p)[..., 0]          # (B, T)
    T = hidden_states.shape[0]
    idx = jnp.arange(T)[None, :]
    mask = (idx >= lengths[:, None]).astype(jnp.float32) * -10000.0
    scores = scores + mask
    probs = jax.nn.softmax(scores, axis=-1)
    hs_bt = jnp.transpose(hidden_states, (1, 0, 2))      # (B, T, H)
    return jnp.einsum("bt,bth->bh", probs, hs_bt)


if __name__ == "__main__":
    H = 32
    key0 = jax.random.PRNGKey(0)
    k_hs, k_wq, k_bq, k_wk, k_bk, k_hs2, k_len2 = jax.random.split(key0, 7)

    bound = 1.0 / (H ** 0.5)  # nn.Linear default init range
    wq = jax.random.uniform(k_wq, (H, H), minval=-bound, maxval=bound, dtype=jnp.float32)
    bq = jax.random.uniform(k_bq, (H,), minval=-bound, maxval=bound, dtype=jnp.float32)
    wk = jax.random.uniform(k_wk, (H, H), minval=-bound, maxval=bound, dtype=jnp.float32)
    bk = jax.random.uniform(k_bk, (H,), minval=-bound, maxval=bound, dtype=jnp.float32)

    # Test 1: small case (single grid step, block == full batch).
    T, B = 8, 2
    hidden_states = jax.random.normal(k_hs, (T, B, H), dtype=jnp.float32)
    lengths = jnp.array([8, 5], dtype=jnp.int32)
    out = jax.block_until_ready(attention_pallas(hidden_states, lengths, wq, bq, wk, bk))
    ref = attention_ref(hidden_states, lengths, wq, bq, wk, bk)
    assert out.shape == (B, H)
    # mean-before-project reassociates f32 sums, so allow a slightly looser tolerance.
    assert jnp.allclose(out, ref, atol=1e-4, rtol=1e-4), (
        f"mismatch (B=2): max abs err {jnp.max(jnp.abs(out - ref))}"
    )

    # Test 2: batched-block path (B=16 -> batch block 8, grid of 2 parallel steps).
    T2, B2 = 8, 16
    hidden_states2 = jax.random.normal(k_hs2, (T2, B2, H), dtype=jnp.float32)
    lengths2 = jax.random.randint(k_len2, (B2,), 1, T2 + 1, dtype=jnp.int32)
    out2 = jax.block_until_ready(attention_pallas(hidden_states2, lengths2, wq, bq, wk, bk))
    ref2 = attention_ref(hidden_states2, lengths2, wq, bq, wk, bk)
    assert out2.shape == (B2, H)
    assert jnp.allclose(out2, ref2, atol=1e-4, rtol=1e-4), (
        f"mismatch (B=16): max abs err {jnp.max(jnp.abs(out2 - ref2))}"
    )

    print("KERNEL_OK")
</pallas_src>

<mosaic_0001>
module attributes {stable_mosaic.version = 11 : i64} {
  func.func @attention_kernel(%arg0: i32, %arg1: memref<8x2x32xf32, #tpu.memory_space<vmem>>, %arg2: memref<2x1xi32, #tpu.memory_space<vmem>>, %arg3: memref<32x32xf32, #tpu.memory_space<vmem>>, %arg4: memref<1x32xf32, #tpu.memory_space<vmem>>, %arg5: memref<32x32xf32, #tpu.memory_space<vmem>>, %arg6: memref<1x32xf32, #tpu.memory_space<vmem>>, %arg7: memref<2x32xf32, #tpu.memory_space<vmem>>) attributes {dimension_semantics = [#tpu.dimension_semantics<parallel>], iteration_bounds = array<i64: 1>, scalar_prefetch = 0 : i64, scratch_operands = 0 : i64, tpu.core_type = #tpu.core_type<tc>, window_params = [{transform_indices = @transform_0, window_bounds = array<i64: 8, 2, 32>}, {transform_indices = @transform_1, window_bounds = array<i64: 2, 1>}, {pipeline_mode = #tpu.pipeline_mode<synchronous>, transform_indices = @transform_2, window_bounds = array<i64: 32, 32>}, {pipeline_mode = #tpu.pipeline_mode<synchronous>, transform_indices = @transform_3, window_bounds = array<i64: 1, 32>}, {pipeline_mode = #tpu.pipeline_mode<synchronous>, transform_indices = @transform_4, window_bounds = array<i64: 32, 32>}, {pipeline_mode = #tpu.pipeline_mode<synchronous>, transform_indices = @transform_5, window_bounds = array<i64: 1, 32>}, {transform_indices = @transform_6, window_bounds = array<i64: 2, 32>}]} {
    %c0 = arith.constant 0 : index
    %c0_0 = arith.constant 0 : index
    %c0_1 = arith.constant 0 : index
    %0 = vector.load %arg1[%c0, %c0_0, %c0_1] : memref<8x2x32xf32, #tpu.memory_space<vmem>>, vector<8x2x32xf32>
    %cst = arith.constant dense<0.000000e+00> : vector<2x32xf32>
    %1 = vector.multi_reduction <add>, %0, %cst [0] : vector<8x2x32xf32> to vector<2x32xf32>
    %cst_2 = arith.constant 8.000000e+00 : f32
    %2 = vector.broadcast %cst_2 : f32 to vector<2x32xf32>
    %3 = arith.divf %1, %2 : vector<2x32xf32>
    %c0_3 = arith.constant 0 : index
    %c0_4 = arith.constant 0 : index
    %4 = vector.load %arg3[%c0_3, %c0_4] : memref<32x32xf32, #tpu.memory_space<vmem>>, vector<32x32xf32>
    %cst_5 = arith.constant dense<0.000000e+00> : vector<2x32xf32>
    %5 = tpu.matmul %3, %4, %cst_5 {dimension_numbers = #tpu.dot_dimension_numbers<[1], [0], [0], [1], [0, 0, 1, 1], [], []>} : vector<2x32xf32>, vector<32x32xf32>, vector<2x32xf32> -> vector<2x32xf32>
    %c0_6 = arith.constant 0 : index
    %c0_7 = arith.constant 0 : index
    %6 = vector.load %arg4[%c0_6, %c0_7] : memref<1x32xf32, #tpu.memory_space<vmem>>, vector<1x32xf32>
    %7 = vector.broadcast %6 : vector<1x32xf32> to vector<2x32xf32>
    %8 = arith.addf %5, %7 : vector<2x32xf32>
    %9 = vector.shape_cast %0 : vector<8x2x32xf32> to vector<16x32xf32>
    %c0_8 = arith.constant 0 : index
    %c0_9 = arith.constant 0 : index
    %10 = vector.load %arg5[%c0_8, %c0_9] : memref<32x32xf32, #tpu.memory_space<vmem>>, vector<32x32xf32>
    %cst_10 = arith.constant dense<0.000000e+00> : vector<16x32xf32>
    %11 = tpu.matmul %9, %10, %cst_10 {dimension_numbers = #tpu.dot_dimension_numbers<[1], [0], [0], [1], [0, 0, 1, 1], [], []>} : vector<16x32xf32>, vector<32x32xf32>, vector<16x32xf32> -> vector<16x32xf32>
    %c0_11 = arith.constant 0 : index
    %c0_12 = arith.constant 0 : index
    %12 = vector.load %arg6[%c0_11, %c0_12] : memref<1x32xf32, #tpu.memory_space<vmem>>, vector<1x32xf32>
    %13 = vector.broadcast %12 : vector<1x32xf32> to vector<16x32xf32>
    %14 = arith.addf %11, %13 : vector<16x32xf32>
    %15 = math.tanh %14 : vector<16x32xf32>
    %16 = vector.shape_cast %15 : vector<16x32xf32> to vector<8x2x32xf32>
    %17 = vector.shape_cast %8 : vector<2x32xf32> to vector<1x2x32xf32>
    %18 = vector.broadcast %17 : vector<1x2x32xf32> to vector<8x2x32xf32>
    %19 = arith.mulf %16, %18 : vector<8x2x32xf32>
    %cst_13 = arith.constant dense<0.000000e+00> : vector<8x2xf32>
    %20 = vector.multi_reduction <add>, %19, %cst_13 [2] : vector<8x2x32xf32> to vector<8x2xf32>
    %21 = vector.shape_cast %20 : vector<8x2xf32> to vector<8x2x1xf32>
    %c0_14 = arith.constant 0 : index
    %c0_15 = arith.constant 0 : index
    %22 = vector.load %arg2[%c0_14, %c0_15] : memref<2x1xi32, #tpu.memory_space<vmem>>, vector<2x1xi32>
    %23 = tpu.iota {dimensions = array<i32: 0>} : vector<8x2x1xi32>
    %24 = vector.shape_cast %22 : vector<2x1xi32> to vector<1x2x1xi32>
    %25 = vector.broadcast %24 : vector<1x2x1xi32> to vector<8x2x1xi32>
    %26 = arith.cmpi sge, %23, %25 : vector<8x2x1xi32>
    %cst_16 = arith.constant -1.000000e+04 : f32
    %cst_17 = arith.constant 0.000000e+00 : f32
    %27 = vector.broadcast %cst_16 : f32 to vector<8x2x1xf32>
    %28 = vector.broadcast %cst_17 : f32 to vector<8x2x1xf32>
    %29 = arith.select %26, %27, %28 : vector<8x2x1xi1>, vector<8x2x1xf32>
    %30 = arith.addf %21, %29 : vector<8x2x1xf32>
    %cst_18 = arith.constant dense<0xFF800000> : vector<2x1xf32>
    %31 = vector.multi_reduction <maximumf>, %30, %cst_18 [0] : vector<8x2x1xf32> to vector<2x1xf32>
    %32 = vector.shape_cast %31 : vector<2x1xf32> to vector<1x2x1xf32>
    %33 = vector.broadcast %32 : vector<1x2x1xf32> to vector<8x2x1xf32>
    %34 = arith.subf %30, %33 : vector<8x2x1xf32>
    %35 = math.exp %34 : vector<8x2x1xf32>
    %cst_19 = arith.constant dense<0.000000e+00> : vector<2x1xf32>
    %36 = vector.multi_reduction <add>, %35, %cst_19 [0] : vector<8x2x1xf32> to vector<2x1xf32>
    %37 = vector.shape_cast %36 : vector<2x1xf32> to vector<1x2x1xf32>
    %38 = vector.broadcast %37 : vector<1x2x1xf32> to vector<8x2x1xf32>
    %39 = arith.divf %35, %38 : vector<8x2x1xf32>
    %40 = vector.broadcast %39 : vector<8x2x1xf32> to vector<8x2x32xf32>
    %41 = arith.mulf %40, %0 : vector<8x2x32xf32>
    %cst_20 = arith.constant dense<0.000000e+00> : vector<2x32xf32>
    %42 = vector.multi_reduction <add>, %41, %cst_20 [0] : vector<8x2x32xf32> to vector<2x32xf32>
    %c0_21 = arith.constant 0 : index
    %c0_22 = arith.constant 0 : index
    %43 = vector.load %arg7[%c0_21, %c0_22] : memref<2x32xf32, #tpu.memory_space<vmem>>, vector<2x32xf32>
    tpu.vector_store %arg7[%c0_21, %c0_22], %42 {strides = array<i32>} : memref<2x32xf32, #tpu.memory_space<vmem>>, vector<2x32xf32>,
    return
  }
  func.func @transform_0(%arg0: i32) -> (i32, i32, i32) {
    %c0_i32 = arith.constant 0 : i32
    %c0_i32_0 = arith.constant 0 : i32
    %c0_i32_1 = arith.constant 0 : i32
    return %c0_i32, %arg0, %c0_i32_0 : i32, i32, i32
  }
  func.func @transform_1(%arg0: i32) -> (i32, i32) {
    %c0_i32 = arith.constant 0 : i32
    %c0_i32_0 = arith.constant 0 : i32
    return %arg0, %c0_i32 : i32, i32
  }
  func.func @transform_2(%arg0: i32) -> (i32, i32) {
    %c0_i32 = arith.constant 0 : i32
    %c0_i32_0 = arith.constant 0 : i32
    %c0_i32_1 = arith.constant 0 : i32
    return %c0_i32, %c0_i32_0 : i32, i32
  }
  func.func @transform_3(%arg0: i32) -> (i32, i32) {
    %c0_i32 = arith.constant 0 : i32
    %c0_i32_0 = arith.constant 0 : i32
    %c0_i32_1 = arith.constant 0 : i32
    return %c0_i32, %c0_i32_0 : i32, i32
  }
  func.func @transform_4(%arg0: i32) -> (i32, i32) {
    %c0_i32 = arith.constant 0 : i32
    %c0_i32_0 = arith.constant 0 : i32
    %c0_i32_1 = arith.constant 0 : i32
    return %c0_i32, %c0_i32_0 : i32, i32
  }
  func.func @transform_5(%arg0: i32) -> (i32, i32) {
    %c0_i32 = arith.constant 0 : i32
    %c0_i32_0 = arith.constant 0 : i32
    %c0_i32_1 = arith.constant 0 : i32
    return %c0_i32, %c0_i32_0 : i32, i32
  }
  func.func @transform_6(%arg0: i32) -> (i32, i32) {
    %c0_i32 = arith.constant 0 : i32
    %c0_i32_0 = arith.constant 0 : i32
    return %arg0, %c0_i32 : i32, i32
  }
}

</mosaic_0001>

<bundles_post_ra>
// kernel: tpu_custom_call.1
= control target key start
LH: loop header
LB: loop body
LE: loop exit
PB: predicated region body
PF: predicated region fallthrough
CT: control target
= control target key end

     0   :  { %11 = vsyncpa [#allocation3], 0  ;;  %s952_s0 = inlined_call_operand.hbm [shape: f32[8,2,32], index: 0, kind: input, shape index: {}]   ;;  %s953_s1 = inlined_call_operand.vmem [shape: s32[2,1], index: 1, kind: input, shape index: {}]   ;;  %s954_s2 = inlined_call_operand.hbm [shape: f32[32,32], index: 2, kind: input, shape index: {}]   ;;  %s955_s3 = inlined_call_operand.vmem [shape: f32[1,32], index: 3, kind: input, shape index: {}]   ;;  %s956_s4 = inlined_call_operand.hbm [shape: f32[32,32], index: 4, kind: input, shape index: {}]   ;;  %s957_s5 = inlined_call_operand.vmem [shape: f32[1,32], index: 5, kind: input, shape index: {}]   ;;  %s958_s6 = inlined_call_operand.hbm [shape: f32[2,32], index: 6, kind: output, shape index: {}]  }
   0x1   :  { %12 = vsyncpa [#allocation6], 0 }
   0x2   :  { %13 = vsyncpa [#allocation4], 0  ;;  %s738_s21 = smov [#allocation5]   ;;  %s644_s25 = scalar_lea.hbm %s954_s2, 512 }
   0x3   :  { %s33_s22 = sshll.u32 %s738_s21, 4  ;;  %p645_p0 = scmp.ne.s32.totalorder %s954_s2, %s644_s25  ;;  %s34_s22 = int_to_ptr.vmem [resolvable:$true] %s33_s22 }
   0x4   :  { %p648_p1 = scmp.lt.u32.totalorder %s644_s25, %s954_s2 }
   0x6   :  { %p650_p2 = pnand %p648_p1, %p645_p0 }
   0x8   :  { %653 = shalt.err (!%p650_p2)
}
   0x9   :  { %s654_s30 = scalar_lea.vmem %s34_s22, 512  ;;  %p659_p4 = scmp.lt.s32.totalorder %s34_s22, %s34_s22 }
   0xa   :  { %p655_p3 = scmp.ne.s32.totalorder %s34_s22, %s654_s30  ;;  %p660_p5 = scmp.lt.s32.totalorder %s654_s30, %s654_s30 }
   0xc   :  { %p661_p6 = por %p660_p5, %p659_p4 }
   0xe   :  { %p662_p7 = pnand %p661_p6, %p655_p3 }
  0x10   :  { %665 = shalt.err (!%p662_p7)
}
  0x11   :  { %s739_s7 = smov 128   ;;  %s740_s8 = smov 8  }
  0x12   :  { %39 = dma.hbm_to_vmem [thread:$0]  %s954_s2, 512, %s34_s22, [#allocation6], %s739_s7, %s739_s7, %s740_s8  }
  0x13   :  { %s741_s11 = smov [#allocation2]   ;;  %s666_s15 = scalar_lea.hbm %s952_s0, 256 }
  0x14   :  { %s19_s12 = sshll.u32 %s741_s11, 4  ;;  %p667_p8 = scmp.ne.s32.totalorder %s952_s0, %s666_s15  ;;  %s20_s12 = int_to_ptr.vmem [resolvable:$true] %s19_s12 }
  0x15   :  { %p670_p9 = scmp.lt.u32.totalorder %s666_s15, %s952_s0 }
  0x17   :  { %p672_p10 = pnand %p670_p9, %p667_p8 }
  0x19   :  { %675 = shalt.err (!%p672_p10)
}
  0x1a   :  { %s676_s20 = scalar_lea.vmem %s20_s12, 256  ;;  %p681_p12 = scmp.lt.s32.totalorder %s20_s12, %s20_s12 }
  0x1b   :  { %p677_p11 = scmp.ne.s32.totalorder %s20_s12, %s676_s20  ;;  %p682_p13 = scmp.lt.s32.totalorder %s676_s20, %s676_s20 }
  0x1d   :  { %p683_p0 = por %p682_p13, %p681_p12 }
  0x1f   :  { %p684_p1 = pnand %p683_p0, %p677_p11 }
  0x21   :  { %687 = shalt.err (!%p684_p1)
}
  0x22   :  { %s742_s2 = smov 32   ;;  %s743_s21 = smov 2  }
  0x23   :  { %25 = dma.hbm_to_vmem [thread:$0]  %s952_s0, 256, %s20_s12, [#allocation3], %s742_s2, %s742_s2, %s743_s21  }
  0x24   :  { %s744_s24 = smov [#allocation7]   ;;  %s688_s28 = scalar_lea.hbm %s956_s4, 512 }
  0x25   :  { %s47_s25 = sshll.u32 %s744_s24, 4  ;;  %p689_p2 = scmp.ne.s32.totalorder %s956_s4, %s688_s28  ;;  %s48_s25 = int_to_ptr.vmem [resolvable:$true] %s47_s25 }
  0x26   :  { %p692_p3 = scmp.lt.u32.totalorder %s688_s28, %s956_s4 }
  0x28   :  { %p694_p4 = pnand %p692_p3, %p689_p2 }
  0x2a   :  { %697 = shalt.err (!%p694_p4)
}
  0x2b   :  { %s698_s11 = scalar_lea.vmem %s48_s25, 512  ;;  %p703_p6 = scmp.lt.s32.totalorder %s48_s25, %s48_s25 }
  0x2c   :  { %p699_p5 = scmp.ne.s32.totalorder %s48_s25, %s698_s11  ;;  %p704_p7 = scmp.lt.s32.totalorder %s698_s11, %s698_s11 }
  0x2e   :  { %p705_p8 = por %p704_p7, %p703_p6 }
  0x30   :  { %p706_p9 = pnand %p705_p8, %p699_p5 }
  0x32   :  { %709 = shalt.err (!%p706_p9)
}
  0x33   :  { %53 = dma.hbm_to_vmem [thread:$0]  %s956_s4, 512, %s48_s25, [#allocation6], %s739_s7, %s739_s7, %s740_s8  }
  0x34   :  { %732 = dma.done.wait [#allocation3], 256  }
  0x35   :  { %733 = vsyncadd [#allocation3], 4294967040 }
  0x36   :  { %734 = dma.done.wait [#allocation6], 1024  }
  0x37   :  { %735 = vsyncadd [#allocation6], 4294966272  ;;  %v200_v0 = vlaneseq  ;;  %v745_v1 = vmov 1983009808   ;;  %v746_v3 = vmov 0.0|0.0   ;;  %vm747_vm0 = vmmov 0  }
  0x38   :  { %v198_v2 = vunpack.c.l.s4 %v745_v1  ;;  %593 = vmatprep.subr.bf16.mxu0 %v746_v3  ;;  %v748_v4 = vmov 0.0   ;;  %v176_v7 = vld [vmem:[#allocation7] sm:$0xff]  ;;  %v177_v8 = vld [vmem:[#allocation7 + $0x8] sm:$0xff]  ;;  %v178_v9 = vld [vmem:[#allocation7 + $0x10] sm:$0xff]  ;;  %vm73_vm1 = vcmask 254976   ;;  %vm102_vm2 = vcmask 261120  }
  0x39   :  { %579 = vmatprep.mubr.msk.f32.mxu0 %vm747_vm0, %v748_v4  ;;  %v201_v6 = vshrl.u32 %v200_v0, 7  ;;  %v599_v11 = vpack.c.bf16 %v177_v8, %v176_v7  ;;  %v179_v12 = vld [vmem:[#allocation7 + $0x18] sm:$0xff]  ;;  %v831_v13 = vld [vmem:[#allocation2] sm:$0x3]  ;;  %v833_v14 = vld [vmem:[#allocation2 + $0x2] sm:$0x3] }
  0x3a   :  { %v199_v5 = vunpack.c.0.s8 %v198_v2  ;;  %v603_v15 = vpack.c.bf16 %v179_v12, %v178_v9  ;;  %v835_v16 = vld [vmem:[#allocation2 + $0x4] sm:$0x3]  ;;  %v837_v17 = vld [vmem:[#allocation2 + $0x6] sm:$0x3]  ;;  %v839_v18 = vld [vmem:[#allocation2 + $0x8] sm:$0x3]  ;;  %v195_v19 = vcombine.low %v831_v13, %v833_v14 }
  0x3b   :  { %600 = vmatprep.subr.bf16.mxu1 %v599_v11  ;;  %v74_v20 = vsel %vm73_vm1, %v831_v13, 0.0  ;;  %v75_v21 = vsel %vm73_vm1, %v833_v14, 0.0  ;;  %v77_v22 = vsel %vm73_vm1, %v835_v16, 0.0  ;;  %v849_v23 = vld [vmem:[#allocation2 + $0xa] sm:$0x3]  ;;  %v196_v25 = vcombine.low %v835_v16, %v837_v17  ;;  %v91_v29 = vld [vmem:[#allocation5] sm:$0xff] }
  0x3c   :  { %v829_v10 = vsub.s32 %v199_v5, %v201_v6  ;;  %602 = vmatpush3.bf16.msra.mxu1 %v599_v11  ;;  %v76_v24 = vadd.f32 %v75_v21, %v74_v20  ;;  %v854_v27 = vld [vmem:[#allocation2 + $0xc] sm:$0x3]  ;;  %v856_v28 = vld [vmem:[#allocation2 + $0xe] sm:$0x3]  ;;  %v79_v30 = vsel %vm73_vm1, %v837_v17, 0.0  ;;  %v212_v31 = vcombine.low %v839_v18, %v849_v23  ;;  %v92_v33 = vld [vmem:[#allocation5 + $0x8] sm:$0xff] }
  0x3d   :  { %604 = vmatprep.subr.bf16.mxu1 %v603_v15  ;;  %v213_v32 = vcombine.low %v854_v27, %v856_v28  ;;  %v93_v34 = vld [vmem:[#allocation5 + $0x10] sm:$0xff]  ;;  %v94_v35 = vld [vmem:[#allocation5 + $0x18] sm:$0xff]  ;;  %v594_v38 = vpack.c.bf16 %v92_v33, %v91_v29  ;;  %v81_v39 = vsel %vm73_vm1, %v839_v18, 0.0  ;;  %v83_v46 = vsel %vm73_vm1, %v849_v23, 0.0 }
  0x3e   :  { %v203_v26 = vrot.slane %v195_v19, %v829_v10  ;;  %v78_v36 = vadd.f32 %v77_v22, %v76_v24  ;;  %v210_v37 = vrot.slane %v196_v25, %v829_v10  ;;  %v220_v40 = vrot.slane %v212_v31, %v829_v10  ;;  %v557_v54 = vld [vmem:[%s957_s5] ss:$0 sm:$0xff] }
  0x3f   :  { %v227_v41 = vrot.slane %v213_v32, %v829_v10  ;;  %595 = vmatpush3.bf16.msra.mxu0 %v594_v38  ;;  %v597_v44 = vpack.c.bf16 %v94_v35, %v93_v34  ;;  %v85_v48 = vsel %vm73_vm1, %v854_v27, 0.0  ;;  %v87_v50 = vsel %vm73_vm1, %v856_v28, 0.0  ;;  %v555_v59 = vld [vmem:[%s955_s3] ss:$0 sm:$0xff] }
  0x40   :  { %606 = vmatpush3.bf16.msra.mxu1 %v603_v15  ;;  %v80_v42 = vadd.f32 %v79_v30, %v78_v36  ;;  %v211_v43 = vcombine.low %v203_v26, %v210_v37  ;;  %596 = vmatprep.subr.bf16.mxu0 %v746_v3  ;;  %v749_v36 = vmov 0   ;;  %v386_v38 = vld [vmem:[%s953_s1] sm:$0x3]  ;;  %vm411_vm11 = vcmask 1024   ;;  %s750_s1 = smov [#allocation8]  }
  0x41   :  { %v228_v45 = vcombine.low %v220_v40, %v227_v41  ;;  %621 = vset.pattern.permute.xlu1 %v749_v36  ;;  %620 = vset.pattern.permute.xlu0 %v749_v36  ;;  %vm388_vm3 = vcmp.le.s32.totalorder %v386_v38, 1  ;;  %vm392_vm4 = vcmp.le.s32.totalorder %v386_v38, 5  ;;  %vm387_vm5 = vcmp.le.s32.totalorder %v386_v38, 0  ;;  %s545_s14 = sshll.u32 %s750_s1, 4  ;;  %s546_s14 = int_to_ptr.vmem [resolvable:$true] %s545_s14 }
  0x42   :  { %v82_v47 = vadd.f32 %v81_v39, %v80_v42  ;;  %590 = vmatprep.mubr.msk.f32.mxu1 %vm102_vm2, %v211_v43  ;;  %vm391_vm6 = vcmp.le.s32.totalorder %v386_v38, 4  ;;  %v396_v42 = vsel %vm388_vm3, -10000.0, %v748_v4  ;;  %vm389_vm7 = vcmp.le.s32.totalorder %v386_v38, 2  ;;  %s710_s15 = scalar_lea.vmem %s546_s14, 32  ;;  %p715_p11 = scmp.lt.s32.totalorder %s546_s14, %s546_s14 }
  0x43   :  { %591 = vmatmul.mubr.msk.f32.vlgmr.msra.gmra.mrb[0].mxu1 %vm102_vm2, %v228_v45  ;;  %598 = vmatpush3.bf16.msra.mxu0 %v597_v44  ;;  %vm390_vm8 = vcmp.le.s32.totalorder %v386_v38, 3  ;;  %vm393_vm9 = vcmp.le.s32.totalorder %v386_v38, 6  ;;  %v400_v43 = vsel %vm392_vm4, -10000.0, %v748_v4  ;;  %v395_v44 = vsel %vm387_vm5, -10000.0, %v748_v4  ;;  %p711_p10 = scmp.ne.s32.totalorder %s546_s14, %s710_s15  ;;  %p716_p12 = scmp.lt.s32.totalorder %s710_s15, %s710_s15 }
  0x44   :  { %v84_v49 = vadd.f32 %v83_v46, %v82_v47  ;;  %v399_v46 = vsel %vm391_vm6, -10000.0, %v748_v4  ;;  %vm394_vm10 = vcmp.le.s32.totalorder %v386_v38, 7 }
  0x45   :  { %p717_p13 = por %p716_p12, %p715_p11 }
  0x46   :  { %v86_v51 = vadd.f32 %v85_v48, %v84_v49  ;;  %v397_v48 = vsel %vm389_vm7, -10000.0, %v748_v4  ;;  %v398_v49 = vsel %vm390_vm8, -10000.0, %v748_v4 }
  0x47   :  { %p718_p0 = pnand %p717_p13, %p711_p10 }
  0x48   :  { %v88_v52 = vadd.f32 %v87_v50, %v86_v51  ;;  %v401_v51 = vsel %vm393_vm9, -10000.0, %v748_v4 }
  0x4a   :  { %v90_v53 = vmul.f32 0.125, %v88_v52 }
  0x4c   :  { %580 = vmatmul.mubr.msk.f32.vlgmr.msra.gmra.mrb[0].mxu0 %vm102_vm2, %v90_v53 }
 0x116   :  { %v592_v55 = vpop.f32.mrb[0].mxu1 }
 0x117   :  { %v305_v56 = vadd.f32 %v592_v55, %v557_v54  ;;  %v299_v57 = vpop.f32.mrb[1].mxu1 }
 0x118   :  { %v300_v58 = vadd.f32 %v557_v54, %v299_v57 }
 0x119   :  { %622 = vtanh.f32 %v305_v56  ;;  %v402_v56 = vsel %vm394_vm10, -10000.0, %v748_v4 }
 0x11a   :  { %624 = vtanh.f32 %v300_v58 }
 0x11f   :  { %v172_v60 = vpop.f32.mrb[0].mxu0 }
 0x120   :  { %v581_v61 = vpop.f32.mrb[1].mxu0  ;;  %v173_v62 = vadd.f32 %v555_v59, %v172_v60 }
 0x123   :  { %v623_v63 = vpop.eup %622 }
 0x124   :  { %v625_v0 = vpop.eup %624  ;;  %v336_v1 = vrot.slane %v623_v63, %v829_v10  ;;  %v329_v2 = vcombine.high %v623_v63, %v623_v63 }
 0x125   :  { %v319_v3 = vrot.slane %v625_v0, %v829_v10  ;;  %v312_v5 = vcombine.high %v625_v0, %v625_v0 }
 0x126   :  { %v358_v6 = vmul.f32 %v336_v1, %v173_v62  ;;  %v344_v7 = vcombine.high %v336_v1, %v336_v1  ;;  %v343_v8 = vrot.slane %v329_v2, %v829_v10 }
 0x127   :  { %v354_v9 = vmul.f32 %v319_v3, %v173_v62  ;;  %v326_v11 = vrot.slane %v312_v5, %v829_v10  ;;  %v327_v12 = vcombine.high %v319_v3, %v319_v3 }
 0x128   :  { %v374_v15 = vsel %vm73_vm1, %v358_v6, 0.0  ;;  %v359_v19 = vmul.f32 %v344_v7, %v173_v62  ;;  %v360_v20 = vmul.f32 %v343_v8, %v173_v62  ;;  %v345_v21 = vcombine.high %v343_v8, %v343_v8 }
 0x129   :  { %375 = vadd.xlane.f32.xlu0 %v374_v15  ;;  %v356_v22 = vmul.f32 %v326_v11, %v173_v62  ;;  %v355_v24 = vmul.f32 %v327_v12, %v173_v62  ;;  %v328_v25 = vcombine.high %v326_v11, %v326_v11  ;;  %v362_v31 = vsel %vm73_vm1, %v354_v9, 0.0 }
 0x12a   :  { %v377_v26 = vsel %vm73_vm1, %v359_v19, 0.0  ;;  %v361_v29 = vmul.f32 %v345_v21, %v173_v62  ;;  %v380_v34 = vsel %vm73_vm1, %v360_v20, 0.0 }
 0x12b   :  { %378 = vadd.xlane.f32.xlu1 %v377_v26  ;;  %v357_v30 = vmul.f32 %v328_v25, %v173_v62  ;;  %v368_v10 = vsel %vm73_vm1, %v356_v22, 0.0  ;;  %v365_v32 = vsel %vm73_vm1, %v355_v24, 0.0 }
 0x12c   :  { %v383_v35 = vsel %vm73_vm1, %v361_v29, 0.0 }
 0x12d   :  { %363 = vadd.xlane.f32.xlu0 %v362_v31  ;;  %v371_v33 = vsel %vm73_vm1, %v357_v30, 0.0 }
 0x12f   :  { %369 = vadd.xlane.f32.xlu1 %v368_v10 }
 0x131   :  { %366 = vadd.xlane.f32.xlu0 %v365_v32 }
 0x133   :  { %372 = vadd.xlane.f32.xlu1 %v371_v33 }
 0x135   :  { %381 = vadd.xlane.f32.xlu0 %v380_v34 }
 0x137   :  { %384 = vadd.xlane.f32.xlu1 %v383_v35 }
 0x1b6   :  { %v376_v37 = vpop.xlane.xlu0 %375 }
 0x1b7   :  { %v407_v54 = vadd.f32 %v399_v46, %v376_v37 }
 0x1b8   :  { %v379_v39 = vpop.xlane.xlu1 %378 }
 0x1b9   :  { %v408_v52 = vadd.f32 %v400_v43, %v379_v39  ;;  %v416_v3 = vsel %vm411_vm11, %v407_v54, -inf }
 0x1ba   :  { %v364_v40 = vpop.xlane.xlu0 %363 }
 0x1bb   :  { %v403_v53 = vadd.f32 %v395_v44, %v364_v40  ;;  %v418_v62 = vsel %vm411_vm11, %v408_v52, -inf }
 0x1bc   :  { %v370_v41 = vpop.xlane.xlu1 %369 }
 0x1bd   :  { %v405_v57 = vadd.f32 %v397_v48, %v370_v41  ;;  %v412_v63 = vsel %vm411_vm11, %v403_v53, -inf }
 0x1be   :  { %v367_v45 = vpop.xlane.xlu0 %366  ;;  %v417_v7 = vmax.f32 %v412_v63, %v416_v3 }
 0x1bf   :  { %v404_v47 = vadd.f32 %v396_v42, %v367_v45  ;;  %v414_v5 = vsel %vm411_vm11, %v405_v57, -inf }
 0x1c0   :  { %v373_v50 = vpop.xlane.xlu1 %372 }
 0x1c1   :  { %v413_v58 = vsel %vm411_vm11, %v404_v47, -inf  ;;  %v406_v59 = vadd.f32 %v398_v49, %v373_v50 }
 0x1c2   :  { %v382_v55 = vpop.xlane.xlu0 %381  ;;  %v419_v2 = vmax.f32 %v413_v58, %v418_v62 }
 0x1c3   :  { %v409_v60 = vadd.f32 %v401_v51, %v382_v55  ;;  %v415_v4 = vsel %vm411_vm11, %v406_v59, -inf }
 0x1c4   :  { %v385_v61 = vpop.xlane.xlu1 %384  ;;  %v424_v11 = vmax.f32 %v417_v7, %v419_v2 }
 0x1c5   :  { %v420_v0 = vsel %vm411_vm11, %v409_v60, -inf  ;;  %v410_v1 = vadd.f32 %v402_v56, %v385_v61 }
 0x1c6   :  { %v421_v8 = vmax.f32 %v414_v5, %v420_v0 }
 0x1c7   :  { %v422_v6 = vsel %vm411_vm11, %v410_v1, -inf }
 0x1c8   :  { %v423_v9 = vmax.f32 %v415_v4, %v422_v6 }
 0x1ca   :  { %v425_v12 = vmax.f32 %v421_v8, %v423_v9 }
 0x1cc   :  { %v426_v15 = vmax.f32 %v424_v11, %v425_v12 }
 0x1ce   :  { %v429_v19 = vsub.f32 %v405_v57, %v426_v15  ;;  %v427_v20 = vsub.f32 %v403_v53, %v426_v15  ;;  %v428_v21 = vsub.f32 %v404_v47, %v426_v15  ;;  %v430_v22 = vsub.f32 %v406_v59, %v426_v15 }
 0x1cf   :  { %v431_v26 = vsub.f32 %v407_v54, %v426_v15  ;;  %v432_v30 = vsub.f32 %v408_v52, %v426_v15  ;;  %v433_v10 = vsub.f32 %v409_v60, %v426_v15  ;;  %v434_v33 = vsub.f32 %v410_v1, %v426_v15 }
 0x1d0   :  { %v439_v24 = vmul.f32 1.442695, %v429_v19  ;;  %v435_v25 = vmul.f32 1.442695, %v427_v20  ;;  %v437_v29 = vmul.f32 1.442695, %v428_v21 }
 0x1d1   :  { %v441_v31 = vmul.f32 1.442695, %v430_v22  ;;  %v443_v32 = vmul.f32 1.442695, %v431_v26  ;;  %v445_v34 = vmul.f32 1.442695, %v432_v30 }
 0x1d2   :  { %626 = vpow2.f32 %v439_v24  ;;  %v447_v35 = vmul.f32 1.442695, %v433_v10  ;;  %v449_v36 = vmul.f32 1.442695, %v434_v33 }
 0x1d3   :  { %628 = vpow2.f32 %v435_v25 }
 0x1d4   :  { %630 = vpow2.f32 %v437_v29 }
 0x1d5   :  { %632 = vpow2.f32 %v441_v31 }
 0x1d6   :  { %634 = vpow2.f32 %v443_v32 }
 0x1d7   :  { %636 = vpow2.f32 %v445_v34 }
 0x1d8   :  { %638 = vpow2.f32 %v447_v35 }
 0x1d9   :  { %640 = vpow2.f32 %v449_v36 }
 0x1dc   :  { %v627_v37 = vpop.eup %626 }
 0x1dd   :  { %v629_v38 = vpop.eup %628  ;;  %v454_v44 = vsel %vm411_vm11, %v627_v37, 0.0 }
 0x1de   :  { %v631_v39 = vpop.eup %630  ;;  %v451_v40 = vsel %vm411_vm11, %v629_v38, 0.0 }
 0x1df   :  { %v452_v41 = vsel %vm411_vm11, %v631_v39, 0.0  ;;  %v633_v42 = vpop.eup %632 }
 0x1e0   :  { %v453_v43 = vadd.f32 %v452_v41, %v451_v40  ;;  %v635_v45 = vpop.eup %634  ;;  %v456_v47 = vsel %vm411_vm11, %v633_v42, 0.0 }
 0x1e1   :  { %v637_v48 = vpop.eup %636  ;;  %v458_v50 = vsel %vm411_vm11, %v635_v45, 0.0 }
 0x1e2   :  { %v455_v46 = vadd.f32 %v454_v44, %v453_v43  ;;  %v639_v51 = vpop.eup %638  ;;  %v460_v53 = vsel %vm411_vm11, %v637_v48, 0.0 }
 0x1e3   :  { %v641_v54 = vpop.eup %640  ;;  %v462_v56 = vsel %vm411_vm11, %v639_v51, 0.0 }
 0x1e4   :  { %v457_v49 = vadd.f32 %v456_v47, %v455_v46  ;;  %v464_v58 = vsel %vm411_vm11, %v641_v54, 0.0 }
 0x1e6   :  { %v459_v52 = vadd.f32 %v458_v50, %v457_v49 }
 0x1e8   :  { %v461_v55 = vadd.f32 %v460_v53, %v459_v52 }
 0x1ea   :  { %v463_v57 = vadd.f32 %v462_v56, %v461_v55 }
 0x1ec   :  { %v465_v59 = vadd.f32 %v464_v58, %v463_v57 }
 0x1ee   :  { %642 = vrcp.f32 %v465_v59 }
 0x1f8   :  { %v643_v60 = vpop.eup %642 }
 0x1f9   :  { %v468_v61 = vmul.f32 %v643_v60, %v631_v39  ;;  %v467_v62 = vmul.f32 %v643_v60, %v629_v38  ;;  %v469_v63 = vmul.f32 %v643_v60, %v627_v37  ;;  %v470_v0 = vmul.f32 %v643_v60, %v633_v42 }
 0x1fa   :  { %v471_v1 = vmul.f32 %v643_v60, %v635_v45  ;;  %v472_v2 = vmul.f32 %v643_v60, %v637_v48  ;;  %v473_v3 = vmul.f32 %v643_v60, %v639_v51  ;;  %v474_v5 = vmul.f32 %v643_v60, %v641_v54 }
 0x1fb   :  { %482 = vperm.xlu1 %621, %v468_v61   ;;  %477 = vperm.xlu0 %620, %v467_v62  }
 0x1ff   :  { %487 = vperm.xlu1 %621, %v469_v63  }
 0x203   :  { %492 = vperm.xlu1 %621, %v470_v0  }
 0x207   :  { %497 = vperm.xlu1 %621, %v471_v1  }
 0x20b   :  { %502 = vperm.xlu1 %621, %v472_v2  }
 0x20f   :  { %507 = vperm.xlu1 %621, %v473_v3  }
 0x213   :  { %512 = vperm.xlu1 %621, %v474_v5  }
 0x27a   :  { %v483_v4 = vpop.permute.xlu1 %482  ;;  %v478_v7 = vpop.permute.xlu0 %477 }
 0x27b   :  { %v516_v9 = vmul.f32 %v483_v4, %v833_v14  ;;  %v515_v11 = vmul.f32 %v478_v7, %v831_v13 }
 0x27d   :  { %v524_v19 = vsel %vm73_vm1, %v516_v9, 0.0  ;;  %v523_v20 = vsel %vm73_vm1, %v515_v11, 0.0 }
 0x27e   :  { %v488_v6 = vpop.permute.xlu1 %487  ;;  %v525_v25 = vadd.f32 %v524_v19, %v523_v20 }
 0x27f   :  { %v517_v12 = vmul.f32 %v488_v6, %v835_v16 }
 0x281   :  { %v526_v22 = vsel %vm73_vm1, %v517_v12, 0.0 }
 0x282   :  { %v493_v8 = vpop.permute.xlu1 %492  ;;  %v527_v13 = vadd.f32 %v526_v22, %v525_v25 }
 0x283   :  { %v518_v21 = vmul.f32 %v493_v8, %v837_v17 }
 0x285   :  { %v528_v29 = vsel %vm73_vm1, %v518_v21, 0.0 }
 0x286   :  { %v498_v15 = vpop.permute.xlu1 %497  ;;  %v529_v30 = vadd.f32 %v528_v29, %v527_v13 }
 0x287   :  { %v519_v24 = vmul.f32 %v498_v15, %v839_v18 }
 0x289   :  { %v530_v16 = vsel %vm73_vm1, %v519_v24, 0.0 }
 0x28a   :  { %v503_v26 = vpop.permute.xlu1 %502  ;;  %v531_v17 = vadd.f32 %v530_v16, %v529_v30 }
 0x28b   :  { %v520_v14 = vmul.f32 %v503_v26, %v849_v23 }
 0x28d   :  { %v532_v10 = vsel %vm73_vm1, %v520_v14, 0.0 }
 0x28e   :  { %v508_v31 = vpop.permute.xlu1 %507  ;;  %v533_v34 = vadd.f32 %v532_v10, %v531_v17 }
 0x28f   :  { %v521_v32 = vmul.f32 %v508_v31, %v854_v27 }
 0x291   :  { %v534_v33 = vsel %vm73_vm1, %v521_v32, 0.0 }
 0x292   :  { %v513_v18 = vpop.permute.xlu1 %512  ;;  %v535_v36 = vadd.f32 %v534_v33, %v533_v34 }
 0x293   :  { %v522_v35 = vmul.f32 %v513_v18, %v856_v28 }
 0x295   :  { %v536_v23 = vsel %vm73_vm1, %v522_v35, 0.0 }
 0x296   :  { %v537_v37 = vadd.f32 %v536_v23, %v535_v36 }
 0x298   :  { %538 = vst.msk [vmem:[#allocation8] sm:$0x3] %vm73_vm1, %v537_v37 }
 0x299   :  { %721 = shalt.err (!%p718_p0)
}
 0x29a   :  { %s722_s18 = scalar_lea.hbm %s958_s6, 32 }
 0x29b   :  { %p723_p1 = scmp.ne.s32.totalorder %s958_s6, %s722_s18  ;;  %p726_p2 = scmp.lt.u32.totalorder %s722_s18, %s958_s6 }
 0x29d   :  { %p728_p3 = pnand %p726_p2, %p723_p1 }
 0x29f   :  { %731 = shalt.err (!%p728_p3)
}
 0x2a0   :  { %548 = dma.vmem_to_hbm [thread:$0]  %s546_s14, 32, %s958_s6, [#allocation4]  }
 0x2a1   :  { %736 = dma.done.wait [#allocation4], 32  }
 0x2a2   :  { %737 = vsyncadd [#allocation4], 4294967264 }
 0x2a3   :  { %552 = vsyncpa [#allocation3], 1 }
 0x2a4   :  { %553 = vsyncpa [#allocation6], 1 }
 0x2a5   :  { %554 = vsyncpa [#allocation4], 1 }

</bundles_post_ra>
